<compile_context>
chip_gen: v6e
topology: v6e:2x2x1
jax: 0.10.0
libtpu: 0.0.40
codegen_flags: <defaults>
</compile_context>

<pallas_src>
import math

import jax
import jax.numpy as jnp
from jax.experimental import pallas as pl
from jax.experimental.pallas import tpu as pltpu

HIDDEN = 128


def critic_mlp_kernel(x_ref, w1_ref, b1_ref, w2_ref, b2_ref, w3_ref, b3_ref, o_ref):
    # fc1: bf16 x @ bf16 W1 on the MXU, f32 accumulation; bias/ReLU in f32.
    h1 = jnp.dot(x_ref[...], w1_ref[...], preferred_element_type=jnp.float32)
    h1 = jnp.maximum(h1 + b1_ref[...], 0.0)
    # fc2: cast the f32 activation to bf16 for the MXU, accumulate in f32.
    h2 = jnp.dot(h1.astype(jnp.bfloat16), w2_ref[...],
                 preferred_element_type=jnp.float32)
    h2 = jnp.maximum(h2 + b2_ref[...], 0.0)
    # fc3: a (tile_b,128)@(128,1) matmul wastes the MXU (N=1); do it as a VPU
    # multiply + XLU lane reduction in f32.  b3 comes from SMEM as a scalar.
    v = jnp.sum(h2 * w3_ref[...], axis=-1) + b3_ref[0]      # (tile_b,)
    # Lane-dense store: output block is (1, tile_b) -> unmasked full-width vst.
    o_ref[...] = v[None, :]


def _default_num_steps(batch):
    """1 grid step on single-TC chips (v5e/v6e); 2 'parallel' steps on v7x so
    the grid shards one step per TensorCore."""
    try:
        kind = jax.devices()[0].device_kind.lower()
    except Exception:
        kind = ""
    n_cores = 2 if ("v7" in kind or "tpu7" in kind) else 1
    return max(1, min(n_cores, int(pl.cdiv(batch, 128))))


def _vmem_estimate(tile_b, d, h):
    """Rough per-step VMEM footprint in bytes."""
    x_buf = 2 * tile_b * d * 2            # bf16 x tile, double-buffered
    w_buf = 2 * (d * h * 2 + h * h * 2)   # bf16 W1/W2 (counted double-buffered)
    b_buf = 2 * (3 * h * 4)               # f32 b1/b2/w3 rows
    out_buf = 2 * tile_b * 4              # f32 (1, tile_b) output tile
    interm = 2 * tile_b * h * 4           # f32 h1/h2 intermediates
    return x_buf + w_buf + b_buf + out_buf + interm


def critic_forward(x, params, *, num_steps=None):
    """Fused Linear->ReLU->Linear->ReLU->Linear forward as one Pallas kernel."""
    w1, b1, w2, b2, w3, b3 = params
    B, D = x.shape
    H = w1.shape[1]

    if num_steps is None:
        num_steps = _default_num_steps(B)
    num_steps = max(1, int(num_steps))

    # tile_b: multiple of 128 (lane-dense output block; also satisfies the
    # sublane-8 constraint on the x tile), sized for the requested step count.
    tile_b = int(pl.cdiv(B, num_steps * 128)) * 128
    # Keep the per-step footprint comfortably under v7x's 64 MiB physical VMEM.
    VMEM_BUDGET = 40 * 1024 * 1024
    while tile_b > 128 and _vmem_estimate(tile_b, D, H) > VMEM_BUDGET:
        tile_b -= 128

    b_pad = int(pl.cdiv(B, tile_b)) * tile_b
    if b_pad != B:
        x = jnp.pad(x, ((0, b_pad - B), (0, 0)))
    grid = (b_pad // tile_b,)

    # bf16 inputs for the two MXU matmuls (f32 accumulation inside the kernel).
    x_bf16 = x.astype(jnp.bfloat16)
    w1_bf16 = w1.astype(jnp.bfloat16)
    w2_bf16 = w2.astype(jnp.bfloat16)

    est = _vmem_estimate(tile_b, D, H)
    vmem_limit = None
    if est > 12 * 1024 * 1024:
        # Above the conservative scoped-VMEM defaults; request enough, capped
        # well below v7x's 64 MiB physical VMEM.
        vmem_limit = int(min(est + (8 << 20), 48 << 20))

    flops = 2 * b_pad * (D * H + H * H + H)
    bytes_accessed = (2 * (b_pad * D + D * H + H * H)      # bf16 streams
                      + 4 * (H + H + H + 1 + b_pad))       # f32 biases + out

    out = pl.pallas_call(
        critic_mlp_kernel,
        out_shape=jax.ShapeDtypeStruct((1, b_pad), jnp.float32),
        grid_spec=pltpu.PrefetchScalarGridSpec(
            num_scalar_prefetch=0,
            grid=grid,
            in_specs=[
                pl.BlockSpec((tile_b, D), lambda i: (i, 0)),        # x tile (streamed, bf16)
                pl.BlockSpec((D, H), lambda i: (0, 0)),             # W1 (resident, bf16)
                pl.BlockSpec((1, H), lambda i: (0, 0)),             # b1 (f32)
                pl.BlockSpec((H, H), lambda i: (0, 0)),             # W2 (resident, bf16)
                pl.BlockSpec((1, H), lambda i: (0, 0)),             # b2 (f32)
                pl.BlockSpec((1, H), lambda i: (0, 0)),             # W3 row (f32)
                pl.BlockSpec(memory_space=pltpu.MemorySpace.SMEM),  # b3 scalar
            ],
            out_specs=pl.BlockSpec((1, tile_b), lambda i: (0, i)),  # lane-dense out
        ),
        compiler_params=pltpu.CompilerParams(
            dimension_semantics=("parallel",),
            vmem_limit_bytes=vmem_limit),
        cost_estimate=pl.CostEstimate(
            flops=flops, transcendentals=0, bytes_accessed=bytes_accessed),
    )(x_bf16, w1_bf16, b1, w2_bf16, b2, w3, b3)

    # (1, b_pad) -> (B, 1), dropping padded rows.
    return out.reshape(b_pad, 1)[:B]


def init_params(key, input_dim, hidden=HIDDEN):
    """PyTorch nn.Linear default init: U(-1/sqrt(fan_in), +1/sqrt(fan_in))."""
    ks = jax.random.split(key, 6)

    def linear(kw, kb, fan_in, fan_out):
        bound = 1.0 / math.sqrt(fan_in)
        # stored as (in, out) so the kernel does x @ W on the MXU
        w = jax.random.uniform(kw, (fan_in, fan_out), jnp.float32, -bound, bound)
        b = jax.random.uniform(kb, (1, fan_out), jnp.float32, -bound, bound)
        return w, b

    w1, b1 = linear(ks[0], ks[1], input_dim, hidden)
    w2, b2 = linear(ks[2], ks[3], hidden, hidden)
    # fc3: weight kept as a (1, hidden) row (== torch fc3.weight layout),
    # bias as a (1,) scalar read from SMEM inside the kernel.
    bound3 = 1.0 / math.sqrt(hidden)
    w3 = jax.random.uniform(ks[4], (1, hidden), jnp.float32, -bound3, bound3)
    b3 = jax.random.uniform(ks[5], (1,), jnp.float32, -bound3, bound3)
    return (w1, b1, w2, b2, w3, b3)


def reference_forward(x, params):
    # f32 reference (matches the PyTorch module); kernel uses bf16 MXU inputs,
    # so compare with a loosened tolerance.
    w1, b1, w2, b2, w3, b3 = params
    h1 = jnp.maximum(x @ w1 + b1, 0.0)
    h2 = jnp.maximum(h1 @ w2 + b2, 0.0)
    return h2 @ w3.T + b3[None, :]


if __name__ == "__main__":
    key = jax.random.PRNGKey(0)
    k_x, k_p, k_x2 = jax.random.split(key, 3)

    # Small-shape correctness check (batch=8, input_dim=32): single grid step.
    batch, input_dim = 8, 32
    x = jax.random.normal(k_x, (batch, input_dim), jnp.float32)
    params = init_params(k_p, input_dim)

    out = jax.block_until_ready(critic_forward(x, params))
    ref = reference_forward(x, params)
    assert out.shape == (batch, 1)
    assert jnp.allclose(out, ref, atol=3e-2, rtol=3e-2)

    # Batch padding, minimum-step grid (1 step of tile_b=640 on single-TC chips).
    batch2 = 520
    x2 = jax.random.normal(k_x2, (batch2, input_dim), jnp.float32)
    out2 = jax.block_until_ready(critic_forward(x2, params))
    ref2 = reference_forward(x2, params)
    assert out2.shape == (batch2, 1)
    assert jnp.allclose(out2, ref2, atol=3e-2, rtol=3e-2)

    # Explicitly exercise the 2-step "parallel" grid path (v7x-style sharding).
    out3 = jax.block_until_ready(critic_forward(x2, params, num_steps=2))
    assert out3.shape == (batch2, 1)
    assert jnp.allclose(out3, ref2, atol=3e-2, rtol=3e-2)

    print("KERNEL_OK")
</pallas_src>

<mosaic_0001>
module attributes {stable_mosaic.version = 11 : i64} {
  func.func @critic_mlp_kernel(%arg0: i32, %arg1: memref<128x32xbf16, #tpu.memory_space<vmem>>, %arg2: memref<32x128xbf16, #tpu.memory_space<vmem>>, %arg3: memref<1x128xf32, #tpu.memory_space<vmem>>, %arg4: memref<128x128xbf16, #tpu.memory_space<vmem>>, %arg5: memref<1x128xf32, #tpu.memory_space<vmem>>, %arg6: memref<1x128xf32, #tpu.memory_space<vmem>>, %arg7: memref<1xf32, #tpu.memory_space<smem>>, %arg8: memref<1x128xf32, #tpu.memory_space<vmem>>) attributes {dimension_semantics = [#tpu.dimension_semantics<parallel>], iteration_bounds = array<i64: 1>, scalar_prefetch = 0 : i64, scratch_operands = 0 : i64, tpu.core_type = #tpu.core_type<tc>, window_params = [{transform_indices = @transform_0, window_bounds = array<i64: 128, 32>}, {pipeline_mode = #tpu.pipeline_mode<synchronous>, transform_indices = @transform_1, window_bounds = array<i64: 32, 128>}, {pipeline_mode = #tpu.pipeline_mode<synchronous>, transform_indices = @transform_2, window_bounds = array<i64: 1, 128>}, {pipeline_mode = #tpu.pipeline_mode<synchronous>, transform_indices = @transform_3, window_bounds = array<i64: 128, 128>}, {pipeline_mode = #tpu.pipeline_mode<synchronous>, transform_indices = @transform_4, window_bounds = array<i64: 1, 128>}, {pipeline_mode = #tpu.pipeline_mode<synchronous>, transform_indices = @transform_5, window_bounds = array<i64: 1, 128>}, {transform_indices = @transform_6, window_bounds = array<i64: 1>}, {transform_indices = @transform_7, window_bounds = array<i64: 1, 128>}]} {
    %c0 = arith.constant 0 : index
    %c0_0 = arith.constant 0 : index
    %0 = vector.load %arg1[%c0, %c0_0] : memref<128x32xbf16, #tpu.memory_space<vmem>>, vector<128x32xbf16>
    %c0_1 = arith.constant 0 : index
    %c0_2 = arith.constant 0 : index
    %1 = vector.load %arg2[%c0_1, %c0_2] : memref<32x128xbf16, #tpu.memory_space<vmem>>, vector<32x128xbf16>
    %cst = arith.constant dense<0.000000e+00> : vector<128x128xf32>
    %2 = tpu.matmul %0, %1, %cst {dimension_numbers = #tpu.dot_dimension_numbers<[1], [0], [0], [1], [0, 0, 1, 1], [], []>} : vector<128x32xbf16>, vector<32x128xbf16>, vector<128x128xf32> -> vector<128x128xf32>
    %c0_3 = arith.constant 0 : index
    %c0_4 = arith.constant 0 : index
    %3 = vector.load %arg3[%c0_3, %c0_4] : memref<1x128xf32, #tpu.memory_space<vmem>>, vector<1x128xf32>
    %4 = vector.broadcast %3 : vector<1x128xf32> to vector<128x128xf32>
    %5 = arith.addf %2, %4 : vector<128x128xf32>
    %cst_5 = arith.constant 0.000000e+00 : f32
    %6 = vector.broadcast %cst_5 : f32 to vector<128x128xf32>
    %7 = arith.maximumf %5, %6 : vector<128x128xf32>
    %8 = arith.truncf %7 : vector<128x128xf32> to vector<128x128xbf16>
    %c0_6 = arith.constant 0 : index
    %c0_7 = arith.constant 0 : index
    %9 = vector.load %arg4[%c0_6, %c0_7] : memref<128x128xbf16, #tpu.memory_space<vmem>>, vector<128x128xbf16>
    %cst_8 = arith.constant dense<0.000000e+00> : vector<128x128xf32>
    %10 = tpu.matmul %8, %9, %cst_8 {dimension_numbers = #tpu.dot_dimension_numbers<[1], [0], [0], [1], [0, 0, 1, 1], [], []>} : vector<128x128xbf16>, vector<128x128xbf16>, vector<128x128xf32> -> vector<128x128xf32>
    %c0_9 = arith.constant 0 : index
    %c0_10 = arith.constant 0 : index
    %11 = vector.load %arg5[%c0_9, %c0_10] : memref<1x128xf32, #tpu.memory_space<vmem>>, vector<1x128xf32>
    %12 = vector.broadcast %11 : vector<1x128xf32> to vector<128x128xf32>
    %13 = arith.addf %10, %12 : vector<128x128xf32>
    %cst_11 = arith.constant 0.000000e+00 : f32
    %14 = vector.broadcast %cst_11 : f32 to vector<128x128xf32>
    %15 = arith.maximumf %13, %14 : vector<128x128xf32>
    %c0_12 = arith.constant 0 : index
    %c0_13 = arith.constant 0 : index
    %16 = vector.load %arg6[%c0_12, %c0_13] : memref<1x128xf32, #tpu.memory_space<vmem>>, vector<1x128xf32>
    %17 = vector.broadcast %16 : vector<1x128xf32> to vector<128x128xf32>
    %18 = arith.mulf %15, %17 : vector<128x128xf32>
    %cst_14 = arith.constant dense<0.000000e+00> : vector<128xf32>
    %19 = vector.multi_reduction <add>, %18, %cst_14 [1] : vector<128x128xf32> to vector<128xf32>
    %c0_15 = arith.constant 0 : index
    %20 = memref.load %arg7[%c0_15] : memref<1xf32, #tpu.memory_space<smem>>
    %21 = vector.broadcast %20 : f32 to vector<128xf32>
    %22 = arith.addf %19, %21 : vector<128xf32>
    %23 = vector.shape_cast %22 : vector<128xf32> to vector<1x128xf32>
    %c0_16 = arith.constant 0 : index
    %c0_17 = arith.constant 0 : index
    %24 = vector.load %arg8[%c0_16, %c0_17] : memref<1x128xf32, #tpu.memory_space<vmem>>, vector<1x128xf32>
    tpu.vector_store %arg8[%c0_16, %c0_17], %23 {strides = array<i32>} : memref<1x128xf32, #tpu.memory_space<vmem>>, vector<1x128xf32>,
    return
  }
  func.func @transform_0(%arg0: i32) -> (i32, i32) {
    %c0_i32 = arith.constant 0 : i32
    %c0_i32_0 = arith.constant 0 : i32
    return %arg0, %c0_i32 : i32, i32
  }
  func.func @transform_1(%arg0: i32) -> (i32, i32) {
    %c0_i32 = arith.constant 0 : i32
    %c0_i32_0 = arith.constant 0 : i32
    %c0_i32_1 = arith.constant 0 : i32
    return %c0_i32, %c0_i32_0 : i32, i32
  }
  func.func @transform_2(%arg0: i32) -> (i32, i32) {
    %c0_i32 = arith.constant 0 : i32
    %c0_i32_0 = arith.constant 0 : i32
    %c0_i32_1 = arith.constant 0 : i32
    return %c0_i32, %c0_i32_0 : i32, i32
  }
  func.func @transform_3(%arg0: i32) -> (i32, i32) {
    %c0_i32 = arith.constant 0 : i32
    %c0_i32_0 = arith.constant 0 : i32
    %c0_i32_1 = arith.constant 0 : i32
    return %c0_i32, %c0_i32_0 : i32, i32
  }
  func.func @transform_4(%arg0: i32) -> (i32, i32) {
    %c0_i32 = arith.constant 0 : i32
    %c0_i32_0 = arith.constant 0 : i32
    %c0_i32_1 = arith.constant 0 : i32
    return %c0_i32, %c0_i32_0 : i32, i32
  }
  func.func @transform_5(%arg0: i32) -> (i32, i32) {
    %c0_i32 = arith.constant 0 : i32
    %c0_i32_0 = arith.constant 0 : i32
    %c0_i32_1 = arith.constant 0 : i32
    return %c0_i32, %c0_i32_0 : i32, i32
  }
  func.func @transform_6(%arg0: i32) -> i32 {
    %c0_i32 = arith.constant 0 : i32
    %c0_i32_0 = arith.constant 0 : i32
    return %c0_i32 : i32
  }
  func.func @transform_7(%arg0: i32) -> (i32, i32) {
    %c0_i32 = arith.constant 0 : i32
    %c0_i32_0 = arith.constant 0 : i32
    return %c0_i32, %arg0 : i32, i32
  }
}

</mosaic_0001>

<bundles_post_ra>
// kernel: tpu_custom_call.1
= control target key start
LH: loop header
LB: loop body
LE: loop exit
PB: predicated region body
PF: predicated region fallthrough
CT: control target
= control target key end

     0   :  { %vm108_vm0 = vcmask 261120   ;;  %s1026_s0 = inlined_call_operand.vmem [shape: bf16[128,32], index: 0, kind: input, shape index: {}]   ;;  %s1027_s1 = inlined_call_operand.vmem [shape: bf16[32,128], index: 1, kind: input, shape index: {}]   ;;  %s1028_s2 = inlined_call_operand.vmem [shape: f32[1,128], index: 2, kind: input, shape index: {}]   ;;  %s1029_s3 = inlined_call_operand.vmem [shape: bf16[128,128], index: 3, kind: input, shape index: {}]   ;;  %s1030_s4 = inlined_call_operand.vmem [shape: f32[1,128], index: 4, kind: input, shape index: {}]   ;;  %s1031_s5 = inlined_call_operand.vmem [shape: f32[1,128], index: 5, kind: input, shape index: {}]   ;;  %s1032_s6 = inlined_call_operand.<no memory space> [shape: f32[1], index: 6, kind: input, shape index: {}]   ;;  %s1033_s7 = inlined_call_operand.hbm [shape: f32[1,128], index: 7, kind: output, shape index: {}]  }
   0x1   :  { %v778_v0 = vld [vmem:[%s1027_s1 + $0x8] sm:$0xff]   ;;  %v779_v1 = vld [vmem:[%s1027_s1] sm:$0xff]   ;;  %v782_v4 = vld [vmem:[%s1026_s0 + $0x10] sm:$0xff]  }
   0x2   :  { %709 = vmatprep.subr.bf16.mxu0 %v778_v0  ;;  %v780_v2 = vld [vmem:[%s1026_s0] sm:$0xff]   ;;  %v781_v3 = vld [vmem:[%s1026_s0 + $0x8] sm:$0xff]   ;;  %v788_v5 = vld [vmem:[%s1029_s3 + $0x38] sm:$0xff]  }
   0x3   :  { %710 = vmatpush3.bf16.msra.mxu0 %v778_v0  ;;  %713 = vmatprep.mubr.msk.bf16.mxu0 %vm108_vm0, %v780_v2  ;;  %v789_v6 = vld [vmem:[%s1029_s3 + $0x30] sm:$0xff]   ;;  %v783_v7 = vld [vmem:[%s1026_s0 + $0x18] sm:$0xff]   ;;  %v784_v8 = vld [vmem:[%s1026_s0 + $0x20] sm:$0xff]  }
   0x4   :  { %711 = vmatprep.subr.bf16.mxu0 %v779_v1  ;;  %761 = vmatprep.subr.bf16.mxu1 %v788_v5  ;;  %v790_v9 = vld [vmem:[%s1029_s3 + $0x28] sm:$0xff]  }
   0x5   :  { %769 = vmatpush3.bf16.msra.mxu1 %v788_v5 }
   0x6   :  { %762 = vmatprep.subr.bf16.mxu1 %v789_v6 }
   0x7   :  { %712 = vmatpush3.bf16.msra.mxu0 %v779_v1 }
   0x8   :  { %729 = vmatprep.subr.bf16.mxu0 %v788_v5 }
   0x9   :  { %770 = vmatpush3.bf16.msra.mxu1 %v789_v6 }
   0xa   :  { %714 = vmatmul.mubr.msk.bf16.vlgmr.msra.gmra.mxu0 %vm108_vm0, %v781_v3 }
   0xb   :  { %717 = vmatprep.mubr.msk.bf16.mxu0 %vm108_vm0, %v782_v4  ;;  %730 = vmatpush3.bf16.msra.mxu0 %v788_v5 }
   0xc   :  { %731 = vmatprep.subr.bf16.mxu0 %v789_v6 }
   0xf   :  { %732 = vmatpush3.bf16.msra.mxu0 %v789_v6 }
  0x10   :  { %13 = vsyncpa [#allocation4], 0  ;;  %733 = vmatprep.subr.bf16.mxu0 %v790_v9  ;;  %v791_v10 = vld [vmem:[%s1029_s3 + $0x20] sm:$0xff]   ;;  %763 = vmatprep.subr.bf16.mxu1 %v790_v9  ;;  %v785_v11 = vld [vmem:[%s1026_s0 + $0x28] sm:$0xff]   ;;  %vm538_vm1 = vcmask 130112   ;;  %vm545_vm2 = vcmask 195712  }
  0x11   :  { %771 = vmatpush3.bf16.msra.mxu1 %v790_v9  ;;  %v792_v12 = vld [vmem:[%s1029_s3 + $0x18] sm:$0xff]   ;;  %v786_v13 = vld [vmem:[%s1026_s0 + $0x30] sm:$0xff]   ;;  %v794_v16 = vld [vmem:[%s1029_s3 + $0x8] sm:$0xff]   ;;  %vm552_vm3 = vcmask 261312   ;;  %vm559_vm4 = vcmask 326912   ;;  %vm566_vm5 = vcmask 392512  }
  0x12   :  { %718 = vmatmul.mubr.msk.bf16.gmra.mxu0 %vm108_vm0, %v783_v7  ;;  %764 = vmatprep.subr.bf16.mxu1 %v791_v10  ;;  %v787_v14 = vld [vmem:[%s1026_s0 + $0x38] sm:$0xff]   ;;  %v793_v15 = vld [vmem:[%s1029_s3 + $0x10] sm:$0xff]   ;;  %v795_v17 = vld [vmem:[%s1029_s3] sm:$0xff]   ;;  %vm573_vm6 = vcmask 458112   ;;  %vm580_vm7 = vcmask 523712   ;;  %vm587_vm8 = vcmask 589312  }
  0x13   :  { %721 = vmatprep.mubr.msk.bf16.mxu0 %vm108_vm0, %v784_v8  ;;  %734 = vmatpush3.bf16.msra.mxu0 %v790_v9  ;;  %v654_v20 = vld [vmem:[%s1028_s2] ss:$0 sm:$0xff]  ;;  %vm594_vm9 = vcmask 654912   ;;  %vm601_vm10 = vcmask 720512   ;;  %vm608_vm11 = vcmask 786112   ;;  %vm615_vm12 = vcmask 851712  }
  0x14   :  { %735 = vmatprep.subr.bf16.mxu0 %v791_v10  ;;  %vm622_vm13 = vcmask 917312   ;;  %vm629_vm14 = vcmask 982912   ;;  %vm636_vm15 = vcmask 1048512  }
  0x15   :  { %772 = vmatpush3.bf16.msra.mxu1 %v791_v10 }
  0x16   :  { %765 = vmatprep.subr.bf16.mxu1 %v792_v12 }
  0x17   :  { %736 = vmatpush3.bf16.msra.mxu0 %v791_v10 }
  0x18   :  { %737 = vmatprep.subr.bf16.mxu0 %v792_v12 }
  0x19   :  { %773 = vmatpush3.bf16.msra.mxu1 %v792_v12 }
  0x1a   :  { %722 = vmatmul.mubr.msk.bf16.gmra.mxu0 %vm108_vm0, %v785_v11  ;;  %766 = vmatprep.subr.bf16.mxu1 %v793_v15  ;;  %v927_v11 = vld [vmem:[%s1030_s4] ss:$0 sm:$0xff] }
  0x1b   :  { %725 = vmatprep.mubr.msk.bf16.mxu0 %vm108_vm0, %v786_v13  ;;  %738 = vmatpush3.bf16.msra.mxu0 %v792_v12 }
  0x1c   :  { %739 = vmatprep.subr.bf16.mxu0 %v793_v15 }
  0x1d   :  { %774 = vmatpush3.bf16.msra.mxu1 %v793_v15 }
  0x1e   :  { %767 = vmatprep.subr.bf16.mxu1 %v794_v16 }
  0x1f   :  { %740 = vmatpush3.bf16.msra.mxu0 %v793_v15  ;;  %v933_v15 = vld [vmem:[%s1031_s5] ss:$0 sm:$0xff] }
  0x20   :  { %741 = vmatprep.subr.bf16.mxu0 %v794_v16 }
  0x21   :  { %775 = vmatpush3.bf16.msra.mxu1 %v794_v16 }
  0x22   :  { %726 = vmatmul.mubr.msk.bf16.gmra.mxu0 %vm108_vm0, %v787_v14  ;;  %768 = vmatprep.subr.bf16.mxu1 %v795_v17 }
  0x23   :  { %742 = vmatpush3.bf16.msra.mxu0 %v794_v16 }
  0x24   :  { %743 = vmatprep.subr.bf16.mxu0 %v795_v17 }
  0x25   :  { %776 = vmatpush3.bf16.msra.mxu1 %v795_v17 }
  0x27   :  { %744 = vmatpush3.bf16.msra.mxu0 %v795_v17 }
  0xca   :  { %v715_v18 = vpop.f32.mrf.mxu0 }
  0xcb   :  { %v176_v24 = vadd.f32 %v715_v18, %v654_v20 }
  0xcc   :  { %v167_v19 = vpop.f32.mrf.mxu0 }
  0xcd   :  { %v168_v22 = vadd.f32 %v654_v20, %v167_v19  ;;  %v232_v31 = vmax.f32 %v176_v24, 0.0 }
  0xce   :  { %v716_v21 = vpop.f32.mrf.mxu0 }
  0xcf   :  { %v179_v23 = vadd.f32 %v716_v21, %v654_v20  ;;  %v230_v29 = vmax.f32 %v168_v22, 0.0 }
  0xd0   :  { %v170_v25 = vpop.f32.mrf.mxu0 }
  0xd1   :  { %v171_v26 = vadd.f32 %v654_v20, %v170_v25  ;;  %v233_v27 = vmax.f32 %v179_v23, 0.0 }
  0xd2   :  { %v719_v28 = vpop.f32.mrf.mxu0 }
  0xd3   :  { %v231_v30 = vmax.f32 %v171_v26, 0.0  ;;  %v247_v34 = vpack.c.bf16 %v233_v27, %v232_v31  ;;  %v192_v38 = vadd.f32 %v719_v28, %v654_v20 }
  0xd4   :  { %v183_v32 = vpop.f32.mrf.mxu0 }
  0xd5   :  { %v246_v33 = vpack.c.bf16 %v231_v30, %v230_v29  ;;  %v184_v36 = vadd.f32 %v654_v20, %v183_v32  ;;  %v236_v45 = vmax.f32 %v192_v38, 0.0 }
  0xd6   :  { %v720_v35 = vpop.f32.mrf.mxu0 }
  0xd7   :  { %v195_v37 = vadd.f32 %v720_v35, %v654_v20  ;;  %745 = vmatprep.mubr.bf16.mxu0 %v246_v33  ;;  %v234_v43 = vmax.f32 %v184_v36, 0.0 }
  0xd8   :  { %v186_v39 = vpop.f32.mrf.mxu0  ;;  %746 = vmatmul.mubr.bf16.vlgmr.msra.gmra.mxu0 %v247_v34 }
  0xd9   :  { %v187_v40 = vadd.f32 %v654_v20, %v186_v39  ;;  %v237_v41 = vmax.f32 %v195_v37, 0.0 }
  0xda   :  { %v723_v42 = vpop.f32.mrf.mxu0 }
  0xdb   :  { %v235_v44 = vmax.f32 %v187_v40, 0.0  ;;  %v249_v48 = vpack.c.bf16 %v237_v41, %v236_v45  ;;  %v208_v52 = vadd.f32 %v723_v42, %v654_v20 }
  0xdc   :  { %v199_v46 = vpop.f32.mrf.mxu0 }
  0xdd   :  { %v248_v47 = vpack.c.bf16 %v235_v44, %v234_v43  ;;  %v200_v50 = vadd.f32 %v654_v20, %v199_v46  ;;  %v240_v59 = vmax.f32 %v208_v52, 0.0 }
  0xde   :  { %v724_v49 = vpop.f32.mrf.mxu0 }
  0xdf   :  { %v211_v51 = vadd.f32 %v724_v49, %v654_v20  ;;  %749 = vmatprep.mubr.bf16.mxu1 %v248_v47  ;;  %v238_v57 = vmax.f32 %v200_v50, 0.0 }
  0xe0   :  { %v202_v53 = vpop.f32.mrf.mxu0  ;;  %750 = vmatmul.mubr.bf16.vlgmr.msra.gmra.mxu1 %v249_v48 }
  0xe1   :  { %v203_v54 = vadd.f32 %v654_v20, %v202_v53  ;;  %v241_v55 = vmax.f32 %v211_v51, 0.0 }
  0xe2   :  { %v727_v56 = vpop.f32.mrf.mxu0 }
  0xe3   :  { %v239_v58 = vmax.f32 %v203_v54, 0.0  ;;  %v251_v62 = vpack.c.bf16 %v241_v55, %v240_v59  ;;  %v224_v2 = vadd.f32 %v727_v56, %v654_v20 }
  0xe4   :  { %v215_v60 = vpop.f32.mrf.mxu0 }
  0xe5   :  { %v250_v61 = vpack.c.bf16 %v239_v58, %v238_v57  ;;  %v216_v0 = vadd.f32 %v654_v20, %v215_v60  ;;  %v244_v8 = vmax.f32 %v224_v2, 0.0 }
  0xe6   :  { %v728_v63 = vpop.f32.mrf.mxu0 }
  0xe7   :  { %v227_v1 = vadd.f32 %v728_v63, %v654_v20  ;;  %753 = vmatprep.mubr.bf16.mxu1 %v250_v61  ;;  %v242_v6 = vmax.f32 %v216_v0, 0.0 }
  0xe8   :  { %v218_v3 = vpop.f32.mrf.mxu0  ;;  %754 = vmatmul.mubr.bf16.gmra.mxu1 %v251_v62 }
  0xe9   :  { %v219_v4 = vadd.f32 %v654_v20, %v218_v3  ;;  %v245_v5 = vmax.f32 %v227_v1, 0.0 }
  0xeb   :  { %v243_v7 = vmax.f32 %v219_v4, 0.0  ;;  %v253_v10 = vpack.c.bf16 %v245_v5, %v244_v8 }
  0xed   :  { %v252_v9 = vpack.c.bf16 %v243_v7, %v242_v6 }
  0xef   :  { %757 = vmatprep.mubr.bf16.mxu1 %v252_v9 }
  0xf0   :  { %758 = vmatmul.mubr.bf16.gmra.mxu1 %v253_v10 }
 0x198   :  { %v747_v12 = vpop.f32.mrf.mxu0 }
 0x199   :  { %v368_v13 = vadd.f32 %v747_v12, %v927_v11 }
 0x19a   :  { %v359_v14 = vpop.f32.mrf.mxu0 }
 0x19b   :  { %v424_v16 = vmax.f32 %v368_v13, 0.0  ;;  %v360_v17 = vadd.f32 %v927_v11, %v359_v14  ;;  %v527_v14 = vlaneseq }
 0x19c   :  { %v748_v18 = vpop.f32.mrf.mxu0 }
 0x19d   :  { %v422_v19 = vmax.f32 %v360_v17, 0.0  ;;  %v371_v20 = vadd.f32 %v748_v18, %v927_v11  ;;  %v447_v21 = vmul.f32 %v933_v15, %v424_v16  ;;  %v966_v16 = vand.u32 127, %v527_v14 }
 0x19e   :  { %v362_v22 = vpop.f32.mrf.mxu0 }
 0x19f   :  { %v425_v23 = vmax.f32 %v371_v20, 0.0  ;;  %v363_v24 = vadd.f32 %v927_v11, %v362_v22  ;;  %465 = vadd.xlane.f32.xlu1 %v447_v21  ;;  %v445_v25 = vmul.f32 %v933_v15, %v422_v19  ;;  %v969_v19 = vshrl.u32 %v527_v14, 7 }
 0x1a0   :  { %v751_v26 = vpop.f32.mrf.mxu1  ;;  %v540_v20 = vadd.s32 4294967280, %v966_v16  ;;  %v975_v21 = vstv %s1032_s6  ;;  %s818_s6 = smov [#allocation3]  }
 0x1a1   :  { %v423_v27 = vmax.f32 %v363_v24, 0.0  ;;  %v384_v28 = vadd.f32 %v751_v26, %v927_v11  ;;  %461 = vadd.xlane.f32.xlu0 %v445_v25  ;;  %v448_v29 = vmul.f32 %v933_v15, %v425_v23  ;;  %v547_v25 = vadd.s32 4294967272, %v966_v16  ;;  %s646_s15 = sshll.u32 %s818_s6, 4  ;;  %s647_s15 = int_to_ptr.vmem [resolvable:$true] %s646_s15 }
 0x1a2   :  { %v375_v30 = vpop.f32.mrf.mxu1  ;;  %s796_s16 = scalar_lea.vmem %s647_s15, 16  ;;  %s800_s17 = scalar_lea.vmem %s647_s15, 32 }
 0x1a3   :  { %v428_v31 = vmax.f32 %v384_v28, 0.0  ;;  %v376_v32 = vadd.f32 %v927_v11, %v375_v30  ;;  %467 = vadd.xlane.f32.xlu1 %v448_v29  ;;  %v446_v33 = vmul.f32 %v933_v15, %v423_v27  ;;  %v543_v27 = vsub.s32 %v540_v20, %v969_v19  ;;  %p797_p0 = scmp.ne.s32.totalorder %s647_s15, %s796_s16  ;;  %p801_p1 = scmp.lt.s32.totalorder %s647_s15, %s647_s15 }
 0x1a4   :  { %v752_v34 = vpop.f32.mrf.mxu1  ;;  %p802_p2 = scmp.lt.s32.totalorder %s800_s17, %s796_s16 }
 0x1a5   :  { %v387_v35 = vadd.f32 %v752_v34, %v927_v11  ;;  %463 = vadd.xlane.f32.xlu0 %v446_v33  ;;  %v426_v37 = vmax.f32 %v376_v32, 0.0  ;;  %v451_v40 = vmul.f32 %v933_v15, %v428_v31  ;;  %v554_v31 = vadd.s32 4294967264, %v966_v16 }
 0x1a6   :  { %v378_v36 = vpop.f32.mrf.mxu1  ;;  %v550_v34 = vsub.s32 %v547_v25, %v969_v19  ;;  %p803_p3 = por %p802_p2, %p801_p1 }
 0x1a7   :  { %v429_v38 = vmax.f32 %v387_v35, 0.0  ;;  %v379_v39 = vadd.f32 %v927_v11, %v378_v36  ;;  %v449_v48 = vmul.f32 %v933_v15, %v426_v37  ;;  %v561_v35 = vadd.s32 4294967256, %v966_v16 }
 0x1a8   :  { %v755_v41 = vpop.f32.mrf.mxu1  ;;  %p804_p4 = pnand %p803_p3, %p797_p0 }
 0x1a9   :  { %v427_v42 = vmax.f32 %v379_v39, 0.0  ;;  %v400_v43 = vadd.f32 %v755_v41, %v927_v11  ;;  %473 = vadd.xlane.f32.xlu0 %v451_v40  ;;  %v452_v44 = vmul.f32 %v933_v15, %v429_v38  ;;  %v568_v38 = vadd.s32 4294967248, %v966_v16 }
 0x1aa   :  { %v391_v45 = vpop.f32.mrf.mxu1  ;;  %v557_v41 = vsub.s32 %v554_v31, %v969_v19  ;;  %v631_v31 = vadd.s32 4294967176, %v966_v16 }
 0x1ab   :  { %v432_v46 = vmax.f32 %v400_v43, 0.0  ;;  %v392_v47 = vadd.f32 %v927_v11, %v391_v45  ;;  %475 = vadd.xlane.f32.xlu1 %v452_v44  ;;  %v450_v51 = vmul.f32 %v933_v15, %v427_v42  ;;  %v564_v45 = vsub.s32 %v561_v35, %v969_v19 }
 0x1ac   :  { %v756_v49 = vpop.f32.mrf.mxu1 }
 0x1ad   :  { %v403_v50 = vadd.f32 %v756_v49, %v927_v11  ;;  %469 = vadd.xlane.f32.xlu0 %v449_v48  ;;  %v430_v53 = vmax.f32 %v392_v47, 0.0  ;;  %v455_v56 = vmul.f32 %v933_v15, %v432_v46  ;;  %v571_v47 = vsub.s32 %v568_v38, %v969_v19 }
 0x1ae   :  { %v394_v52 = vpop.f32.mrf.mxu1  ;;  %v575_v48 = vadd.s32 4294967240, %v966_v16 }
 0x1af   :  { %v433_v54 = vmax.f32 %v403_v50, 0.0  ;;  %v395_v55 = vadd.f32 %v927_v11, %v394_v52  ;;  %471 = vadd.xlane.f32.xlu1 %v450_v51  ;;  %v453_v63 = vmul.f32 %v933_v15, %v430_v53  ;;  %v582_v53 = vadd.s32 4294967232, %v966_v16 }
 0x1b0   :  { %v759_v57 = vpop.f32.mrf.mxu1 }
 0x1b1   :  { %v431_v58 = vmax.f32 %v395_v55, 0.0  ;;  %481 = vadd.xlane.f32.xlu0 %v455_v56  ;;  %v456_v59 = vmul.f32 %v933_v15, %v433_v54  ;;  %v416_v61 = vadd.f32 %v759_v57, %v927_v11  ;;  %v596_v55 = vadd.s32 4294967216, %v966_v16 }
 0x1b2   :  { %v407_v60 = vpop.f32.mrf.mxu1 }
 0x1b3   :  { %v408_v62 = vadd.f32 %v927_v11, %v407_v60  ;;  %483 = vadd.xlane.f32.xlu1 %v456_v59  ;;  %v454_v2 = vmul.f32 %v933_v15, %v431_v58  ;;  %v436_v4 = vmax.f32 %v416_v61, 0.0  ;;  %v589_v59 = vadd.s32 4294967224, %v966_v16 }
 0x1b4   :  { %v760_v0 = vpop.f32.mrf.mxu1  ;;  %v578_v60 = vsub.s32 %v575_v48, %v969_v19 }
 0x1b5   :  { %v434_v1 = vmax.f32 %v408_v62, 0.0  ;;  %477 = vadd.xlane.f32.xlu0 %v453_v63  ;;  %v419_v5 = vadd.f32 %v760_v0, %v927_v11  ;;  %v459_v12 = vmul.f32 %v933_v15, %v436_v4  ;;  %v603_v62 = vadd.s32 4294967208, %v966_v16 }
 0x1b6   :  { %v410_v3 = vpop.f32.mrf.mxu1 }
 0x1b7   :  { %v411_v6 = vadd.f32 %v927_v11, %v410_v3  ;;  %479 = vadd.xlane.f32.xlu1 %v454_v2  ;;  %v457_v7 = vmul.f32 %v933_v15, %v434_v1  ;;  %v437_v9 = vmax.f32 %v419_v5, 0.0  ;;  %v533_v11 = vadd.s32 4294967288, %v966_v16 }
 0x1b8   :  { %v585_v2 = vsub.s32 %v582_v53, %v969_v19  ;;  %v599_v3 = vsub.s32 %v596_v55, %v969_v19  ;;  %v610_v5 = vadd.s32 4294967200, %v966_v16 }
 0x1b9   :  { %v435_v8 = vmax.f32 %v411_v6, 0.0  ;;  %485 = vadd.xlane.f32.xlu0 %v457_v7  ;;  %v460_v13 = vmul.f32 %v933_v15, %v437_v9  ;;  %v536_v22 = vsub.s32 %v533_v11, %v969_v19 }
 0x1bb   :  { %v458_v10 = vmul.f32 %v933_v15, %v435_v8  ;;  %v531_v15 = vsub.s32 %v966_v16, %v969_v19  ;;  %v592_v8 = vsub.s32 %v589_v59, %v969_v19 }
 0x1bd   :  { %487 = vadd.xlane.f32.xlu1 %v458_v10  ;;  %489 = vadd.xlane.f32.xlu0 %v459_v12  ;;  %v606_v12 = vsub.s32 %v603_v62, %v969_v19 }
 0x1c1   :  { %491 = vadd.xlane.f32.xlu1 %v460_v13 }
 0x228   :  { %v466_v17 = vpop.xlane.xlu1 %465 }
 0x229   :  { %v497_v29 = vadd.f32 %v975_v21, %v466_v17 }
 0x22a   :  { %v462_v18 = vpop.xlane.xlu0 %461 }
 0x22b   :  { %v495_v23 = vadd.f32 %v975_v21, %v462_v18  ;;  %v544_v40 = vrot.slane %v497_v29, %v543_v27  ;;  %v617_v18 = vadd.s32 4294967192, %v966_v16 }
 0x22c   :  { %v468_v28 = vpop.xlane.xlu1 %467 }
 0x22d   :  { %v532_v32 = vrot.slane %v495_v23, %v531_v15  ;;  %v498_v36 = vadd.f32 %v975_v21, %v468_v28  ;;  %v624_v23 = vadd.s32 4294967184, %v966_v16 }
 0x22e   :  { %v464_v24 = vpop.xlane.xlu0 %463 }
 0x22f   :  { %v496_v26 = vadd.f32 %v975_v21, %v464_v24  ;;  %v551_v46 = vrot.slane %v498_v36, %v550_v34  ;;  %v627_v35 = vsub.s32 %v624_v23, %v969_v19 }
 0x231   :  { %v537_v30 = vrot.slane %v496_v26, %v536_v22  ;;  %v613_v22 = vsub.s32 %v610_v5, %v969_v19 }
 0x232   :  { %v474_v33 = vpop.xlane.xlu0 %473 }
 0x233   :  { %v539_v37 = vsel %vm538_vm1, %v537_v30, %v532_v32  ;;  %v501_v50 = vadd.f32 %v975_v21, %v474_v33  ;;  %v620_v30 = vsub.s32 %v617_v18, %v969_v19 }
 0x234   :  { %v476_v39 = vpop.xlane.xlu1 %475  ;;  %v546_v43 = vsel %vm545_vm2, %v544_v40, %v539_v37 }
 0x235   :  { %v553_v54 = vsel %vm552_vm3, %v551_v46, %v546_v43  ;;  %v502_v61 = vadd.f32 %v975_v21, %v476_v39  ;;  %v572_v0 = vrot.slane %v501_v50, %v571_v47 }
 0x236   :  { %v470_v42 = vpop.xlane.xlu0 %469 }
 0x237   :  { %v499_v44 = vadd.f32 %v975_v21, %v470_v42  ;;  %v579_v9 = vrot.slane %v502_v61, %v578_v60 }
 0x238   :  { %v472_v49 = vpop.xlane.xlu1 %471 }
 0x239   :  { %v558_v51 = vrot.slane %v499_v44, %v557_v41  ;;  %v500_v52 = vadd.f32 %v975_v21, %v472_v49  ;;  %v634_v41 = vsub.s32 %v631_v31, %v969_v19 }
 0x23a   :  { %v482_v56 = vpop.xlane.xlu0 %481 }
 0x23b   :  { %v560_v57 = vsel %vm559_vm4, %v558_v51, %v553_v54  ;;  %v565_v58 = vrot.slane %v500_v52, %v564_v45  ;;  %v505_v10 = vadd.f32 %v975_v21, %v482_v56 }
 0x23c   :  { %v484_v63 = vpop.xlane.xlu1 %483 }
 0x23d   :  { %v567_v1 = vsel %vm566_vm5, %v565_v58, %v560_v57  ;;  %v506_v14 = vadd.f32 %v975_v21, %v484_v63  ;;  %v600_v27 = vrot.slane %v505_v10, %v599_v3 }
 0x23e   :  { %v478_v4 = vpop.xlane.xlu0 %477  ;;  %v574_v6 = vsel %vm573_vm6, %v572_v0, %v567_v1 }
 0x23f   :  { %v503_v7 = vadd.f32 %v975_v21, %v478_v4  ;;  %v581_v20 = vsel %vm580_vm7, %v579_v9, %v574_v6  ;;  %v607_v28 = vrot.slane %v506_v14, %v606_v12 }
 0x240   :  { %v480_v13 = vpop.xlane.xlu1 %479 }
 0x241   :  { %v586_v11 = vrot.slane %v503_v7, %v585_v2  ;;  %v504_v17 = vadd.f32 %v975_v21, %v480_v13 }
 0x242   :  { %v486_v15 = vpop.xlane.xlu0 %485 }
 0x243   :  { %v588_v24 = vsel %vm587_vm8, %v586_v11, %v581_v20  ;;  %v593_v25 = vrot.slane %v504_v17, %v592_v8  ;;  %v507_v26 = vadd.f32 %v975_v21, %v486_v15 }
 0x245   :  { %v595_v29 = vsel %vm594_vm9, %v593_v25, %v588_v24  ;;  %v614_v33 = vrot.slane %v507_v26, %v613_v22 }
 0x246   :  { %v602_v32 = vsel %vm601_vm10, %v600_v27, %v595_v29  ;;  %v488_v34 = vpop.xlane.xlu1 %487  ;;  %v490_v36 = vpop.xlane.xlu0 %489 }
 0x247   :  { %v609_v37 = vsel %vm608_vm11, %v607_v28, %v602_v32  ;;  %v508_v38 = vadd.f32 %v975_v21, %v488_v34  ;;  %v509_v39 = vadd.f32 %v975_v21, %v490_v36 }
 0x248   :  { %v616_v42 = vsel %vm615_vm12, %v614_v33, %v609_v37 }
 0x249   :  { %v621_v40 = vrot.slane %v508_v38, %v620_v30  ;;  %v628_v43 = vrot.slane %v509_v39, %v627_v35 }
 0x24a   :  { %v492_v44 = vpop.xlane.xlu1 %491 }
 0x24b   :  { %v510_v16 = vadd.f32 %v975_v21, %v492_v44  ;;  %v623_v45 = vsel %vm622_vm13, %v621_v40, %v616_v42 }
 0x24c   :  { %v630_v47 = vsel %vm629_vm14, %v628_v43, %v623_v45 }
 0x24d   :  { %v635_v46 = vrot.slane %v510_v16, %v634_v41 }
 0x24f   :  { %v637_v48 = vsel %vm636_vm15, %v635_v46, %v630_v47 }
 0x250   :  { %639 = vst [vmem:[#allocation3] sm:$0x1] %v637_v48 }
 0x251   :  { %807 = shalt.err (!%p804_p4)
}
 0x252   :  { %649 = dma.vmem_to_hbm [thread:$0]  %s647_s15, 16, %s1033_s7, [#allocation4]  }
 0x253   :  { %816 = dma.done.wait [#allocation4], 16  }
 0x254   :  { %817 = vsyncadd [#allocation4], 4294967280 }
 0x255   :  { %653 = vsyncpa [#allocation4], 1 }

</bundles_post_ra>
